<compile_context>
chip_gen: v7x
topology: tpu7x:2x2x1
jax: 0.10.0
libtpu: 0.0.40
codegen_flags: <defaults>
</compile_context>

<pallas_src>
import functools

import jax
import jax.numpy as jnp
from jax.experimental import pallas as pl
from jax.experimental.pallas import tpu as pltpu

N_THETAS = 20
WIDTHS = [1, 128, 128, 64, 64, 32, 16, N_THETAS]   # true layer widths
PAD = 128                                          # lane-dense padded width
N_HIDDEN = 5                                       # 128x128 matmul layers
MAX_B_TILE = 2048                                  # batch tile upper bound


# ---------------------------------------------------------------------------
# Kernel
# ---------------------------------------------------------------------------
def _mlp_kernel(x_ref, w1_ref, b1_ref, wstack_ref, bstack_ref, w7_ref, o_ref):
    # x_ref: (b_tile, 1) f32
    # w1_ref/b1_ref: (1, 128) f32          (layer 1, VPU broadcast path)
    # wstack_ref:    (5, 128, 128) bf16    (layers 2..6, zero-padded)
    # bstack_ref:    (5, 128) f32          (biases 2..6, zero-padded lanes)
    # w7_ref:        (128, N_THETAS) bf16  (final layer, no bias)
    # o_ref:         (b_tile, N_THETAS) f32
    x = x_ref[...]

    # Layer 1: contraction dim K=1 -> broadcast outer product on the VPU (f32).
    h32 = jnp.maximum(x * w1_ref[...] + b1_ref[...], 0.0)      # (b_tile, 128) f32
    h = h32.astype(jnp.bfloat16)                                # bf16 between layers

    biases = bstack_ref[...]                                    # (5, 128) f32
    for li in range(N_HIDDEN):                                  # unrolled, static
        acc = jnp.dot(h, wstack_ref[li],
                      preferred_element_type=jnp.float32)       # MXU, f32 acc
        h = jnp.maximum(acc + biases[li], 0.0).astype(jnp.bfloat16)

    # Final layer: no bias, no activation. Narrow (N_THETAS-lane) store keeps
    # the output DMA 6.4x smaller than a 128-lane padded writeback.
    o_ref[...] = jnp.dot(h, w7_ref[...], preferred_element_type=jnp.float32)


# ---------------------------------------------------------------------------
# Wrapper
# ---------------------------------------------------------------------------
def _cdiv(a, b):
    return (a + b - 1) // b


def _round_up(n, m):
    return ((n + m - 1) // m) * m


def _choose_tiling(batch, max_tile):
    """Minimize padding; keep the grid even (>=2) so v7x uses both TCs."""
    grid = max(_cdiv(batch, max_tile), 1)
    if batch >= 16:
        grid = _round_up(grid, 2)
    b_tile = _round_up(_cdiv(batch, grid), 8)
    padded = grid * b_tile
    return grid, b_tile, padded


@functools.partial(jax.jit, static_argnames=("max_tile",))
def complex_intercept_forward(x, packed_params, max_tile=MAX_B_TILE):
    """x: (batch, 1) float32.  packed_params: output of pack_params()."""
    batch = x.shape[0]
    assert x.shape[1] == 1

    grid, b_tile, padded = _choose_tiling(batch, max_tile)
    if padded != batch:
        x = jnp.pad(x, ((0, padded - batch), (0, 0)))

    w1, b1, w_stack, b_stack, w7 = packed_params

    in_specs = [
        pl.BlockSpec((b_tile, 1), lambda i: (i, 0)),                       # x
        pl.BlockSpec((1, PAD), lambda i: (0, 0)),                          # w1
        pl.BlockSpec((1, PAD), lambda i: (0, 0)),                          # b1
        pl.BlockSpec((N_HIDDEN, PAD, PAD), lambda i: (0, 0, 0)),           # w_stack
        pl.BlockSpec((N_HIDDEN, PAD), lambda i: (0, 0)),                   # b_stack
        pl.BlockSpec((PAD, N_THETAS), lambda i: (0, 0)),                   # w7
    ]

    # Advisory cost hint so XLA schedules the pad / row-slice around the call.
    per_row_flops = 2 * PAD + N_HIDDEN * 2 * PAD * PAD + 2 * PAD * N_THETAS
    param_bytes = sum(int(p.size) * p.dtype.itemsize for p in packed_params)
    cost = pl.CostEstimate(
        flops=padded * per_row_flops,
        transcendentals=0,
        bytes_accessed=padded * 4 + padded * N_THETAS * 4 + param_bytes,
    )

    out = pl.pallas_call(
        _mlp_kernel,
        out_shape=jax.ShapeDtypeStruct((padded, N_THETAS), jnp.float32),
        grid_spec=pltpu.PrefetchScalarGridSpec(
            num_scalar_prefetch=0,
            grid=(grid,),
            in_specs=in_specs,
            out_specs=pl.BlockSpec((b_tile, N_THETAS), lambda i: (i, 0)),
        ),
        compiler_params=pltpu.CompilerParams(
            dimension_semantics=("parallel",),
            vmem_limit_bytes=32 * 1024 * 1024,
        ),
        cost_estimate=cost,
    )(x, w1, b1, w_stack, b_stack, w7)

    if padded != batch:
        out = out[:batch]
    return out


# ---------------------------------------------------------------------------
# Parameter handling
# ---------------------------------------------------------------------------
def init_params(key):
    """Deterministic init mimicking PyTorch Linear default U(-1/sqrt(fan_in), +).

    Weights stored transposed w.r.t. PyTorch: (in_features, out_features).
    """
    params = []
    n_layers = len(WIDTHS) - 1
    keys = jax.random.split(key, 2 * n_layers)
    for li in range(n_layers):
        fan_in, fan_out = WIDTHS[li], WIDTHS[li + 1]
        bound = 1.0 / (fan_in ** 0.5)
        w = jax.random.uniform(keys[2 * li], (fan_in, fan_out),
                               minval=-bound, maxval=bound, dtype=jnp.float32)
        params.append(w)
        if li < n_layers - 1:  # last Linear has bias=False
            b = jax.random.uniform(keys[2 * li + 1], (1, fan_out),
                                   minval=-bound, maxval=bound,
                                   dtype=jnp.float32)
            params.append(b)
    return tuple(params)


def pack_params(params):
    """Zero-pad hidden matmul layers to 128x128 (bf16), stack them, and keep
    biases f32.  Padded bias lanes are exactly 0, so padded activation lanes
    stay 0 through ReLU and contribute nothing downstream.
    The final weight is padded only on its input dim: (128, N_THETAS) bf16.
    """
    (w1, b1, w2, b2, w3, b3, w4, b4, w5, b5, w6, b6, w7) = params

    def pad_w(w):
        fi, fo = w.shape
        return jnp.pad(w, ((0, PAD - fi), (0, PAD - fo))).astype(jnp.bfloat16)

    def pad_b(b):
        return jnp.pad(b, ((0, 0), (0, PAD - b.shape[1]))).astype(jnp.float32)

    w_stack = jnp.stack([pad_w(w) for w in (w2, w3, w4, w5, w6)], axis=0)
    b_stack = jnp.concatenate([pad_b(b) for b in (b2, b3, b4, b5, b6)], axis=0)
    w7_pad = jnp.pad(w7, ((0, PAD - w7.shape[0]), (0, 0))).astype(jnp.bfloat16)

    return (
        w1.astype(jnp.float32),   # (1, 128) f32 for the VPU broadcast
        b1.astype(jnp.float32),   # (1, 128) f32
        w_stack,                  # (5, 128, 128) bf16
        b_stack,                  # (5, 128) f32
        w7_pad,                   # (128, N_THETAS) bf16
    )


# ---------------------------------------------------------------------------
# Plain-JAX references
# ---------------------------------------------------------------------------
def reference_forward_bf16(x, params):
    """Mirrors the kernel's bf16-matmul / f32-accumulate semantics."""
    (w1, b1, w2, b2, w3, b3, w4, b4, w5, b5, w6, b6, w7) = params
    h = jnp.maximum(x * w1 + b1, 0.0)
    for w, b in ((w2, b2), (w3, b3), (w4, b4), (w5, b5), (w6, b6)):
        acc = jnp.dot(h.astype(jnp.bfloat16), w.astype(jnp.bfloat16),
                      preferred_element_type=jnp.float32)
        h = jnp.maximum(acc + b, 0.0)
    return jnp.dot(h.astype(jnp.bfloat16), w7.astype(jnp.bfloat16),
                   preferred_element_type=jnp.float32)


def reference_forward_f32(x, params):
    """Pure f32 reference (original PyTorch module semantics)."""
    (w1, b1, w2, b2, w3, b3, w4, b4, w5, b5, w6, b6, w7) = params
    h = jnp.maximum(x * w1 + b1, 0.0)
    for w, b in ((w2, b2), (w3, b3), (w4, b4), (w5, b5), (w6, b6)):
        h = jnp.maximum(h @ w + b, 0.0)
    return h @ w7


# ---------------------------------------------------------------------------
if __name__ == "__main__":
    key = jax.random.PRNGKey(0)
    pkey, xkey1, xkey2 = jax.random.split(key, 3)

    params = init_params(pkey)
    packed = pack_params(params)

    # --- small batch (single tile) ------------------------------------------
    batch = 8
    x = jax.random.normal(xkey1, (batch, 1), dtype=jnp.float32)
    out = jax.block_until_ready(complex_intercept_forward(x, packed))
    assert out.shape == (batch, N_THETAS), out.shape

    ref_bf16 = reference_forward_bf16(x, params)
    ref_f32 = reference_forward_f32(x, params)
    assert jnp.allclose(out, ref_bf16, atol=1e-2, rtol=1e-2), (
        float(jnp.max(jnp.abs(out - ref_bf16))))
    assert jnp.allclose(out, ref_f32, atol=5e-2, rtol=5e-2), (
        float(jnp.max(jnp.abs(out - ref_f32))))

    # --- larger, non-tile-aligned batch (multi-step grid + padding path) ----
    batch2 = 2100
    x2 = jax.random.normal(xkey2, (batch2, 1), dtype=jnp.float32)
    out2 = jax.block_until_ready(complex_intercept_forward(x2, packed))
    assert out2.shape == (batch2, N_THETAS), out2.shape

    ref2 = reference_forward_bf16(x2, params)
    assert jnp.allclose(out2, ref2, atol=1e-2, rtol=1e-2), (
        float(jnp.max(jnp.abs(out2 - ref2))))

    print("KERNEL_OK")
</pallas_src>

<mosaic_0001>
module attributes {stable_mosaic.version = 11 : i64} {
  func.func @_mlp_kernel(%arg0: i32, %arg1: memref<8x1xf32, #tpu.memory_space<vmem>>, %arg2: memref<1x128xf32, #tpu.memory_space<vmem>>, %arg3: memref<1x128xf32, #tpu.memory_space<vmem>>, %arg4: memref<5x128x128xbf16, #tpu.memory_space<vmem>>, %arg5: memref<5x128xf32, #tpu.memory_space<vmem>>, %arg6: memref<128x20xbf16, #tpu.memory_space<vmem>>, %arg7: memref<8x20xf32, #tpu.memory_space<vmem>>) attributes {dimension_semantics = [#tpu.dimension_semantics<parallel>], iteration_bounds = array<i64: 1>, scalar_prefetch = 0 : i64, scratch_operands = 0 : i64, tpu.core_type = #tpu.core_type<tc>, window_params = [{transform_indices = @transform_0, window_bounds = array<i64: 8, 1>}, {pipeline_mode = #tpu.pipeline_mode<synchronous>, transform_indices = @transform_1, window_bounds = array<i64: 1, 128>}, {pipeline_mode = #tpu.pipeline_mode<synchronous>, transform_indices = @transform_2, window_bounds = array<i64: 1, 128>}, {pipeline_mode = #tpu.pipeline_mode<synchronous>, transform_indices = @transform_3, window_bounds = array<i64: 5, 128, 128>}, {pipeline_mode = #tpu.pipeline_mode<synchronous>, transform_indices = @transform_4, window_bounds = array<i64: 5, 128>}, {pipeline_mode = #tpu.pipeline_mode<synchronous>, transform_indices = @transform_5, window_bounds = array<i64: 128, 20>}, {transform_indices = @transform_6, window_bounds = array<i64: 8, 20>}]} {
    %c0 = arith.constant 0 : index
    %c0_0 = arith.constant 0 : index
    %0 = vector.load %arg1[%c0, %c0_0] : memref<8x1xf32, #tpu.memory_space<vmem>>, vector<8x1xf32>
    %c0_1 = arith.constant 0 : index
    %c0_2 = arith.constant 0 : index
    %1 = vector.load %arg2[%c0_1, %c0_2] : memref<1x128xf32, #tpu.memory_space<vmem>>, vector<1x128xf32>
    %2 = vector.broadcast %0 : vector<8x1xf32> to vector<8x128xf32>
    %3 = vector.broadcast %1 : vector<1x128xf32> to vector<8x128xf32>
    %4 = arith.mulf %2, %3 : vector<8x128xf32>
    %c0_3 = arith.constant 0 : index
    %c0_4 = arith.constant 0 : index
    %5 = vector.load %arg3[%c0_3, %c0_4] : memref<1x128xf32, #tpu.memory_space<vmem>>, vector<1x128xf32>
    %6 = vector.broadcast %5 : vector<1x128xf32> to vector<8x128xf32>
    %7 = arith.addf %4, %6 : vector<8x128xf32>
    %cst = arith.constant 0.000000e+00 : f32
    %8 = vector.broadcast %cst : f32 to vector<8x128xf32>
    %9 = arith.maximumf %7, %8 : vector<8x128xf32>
    %10 = arith.truncf %9 : vector<8x128xf32> to vector<8x128xbf16>
    %c0_5 = arith.constant 0 : index
    %c0_6 = arith.constant 0 : index
    %11 = vector.load %arg5[%c0_5, %c0_6] : memref<5x128xf32, #tpu.memory_space<vmem>>, vector<5x128xf32>
    %c0_7 = arith.constant 0 : index
    %c0_8 = arith.constant 0 : index
    %c0_9 = arith.constant 0 : index
    %12 = vector.load %arg4[%c0_7, %c0_8, %c0_9] : memref<5x128x128xbf16, #tpu.memory_space<vmem>>, vector<1x128x128xbf16>
    %13 = vector.shape_cast %12 : vector<1x128x128xbf16> to vector<128x128xbf16>
    %cst_10 = arith.constant dense<0.000000e+00> : vector<8x128xf32>
    %14 = tpu.matmul %10, %13, %cst_10 {dimension_numbers = #tpu.dot_dimension_numbers<[1], [0], [0], [1], [0, 0, 1, 1], [], []>} : vector<8x128xbf16>, vector<128x128xbf16>, vector<8x128xf32> -> vector<8x128xf32>
    %15 = vector.extract_strided_slice %11 {offsets = [0, 0], sizes = [1, 128], strides = [1, 1]} : vector<5x128xf32> to vector<1x128xf32>
    %16 = vector.shape_cast %15 : vector<1x128xf32> to vector<128xf32>
    %17 = vector.shape_cast %16 : vector<128xf32> to vector<1x128xf32>
    %18 = vector.broadcast %17 : vector<1x128xf32> to vector<8x128xf32>
    %19 = arith.addf %14, %18 : vector<8x128xf32>
    %cst_11 = arith.constant 0.000000e+00 : f32
    %20 = vector.broadcast %cst_11 : f32 to vector<8x128xf32>
    %21 = arith.maximumf %19, %20 : vector<8x128xf32>
    %22 = arith.truncf %21 : vector<8x128xf32> to vector<8x128xbf16>
    %c1 = arith.constant 1 : index
    %c0_12 = arith.constant 0 : index
    %c0_13 = arith.constant 0 : index
    %23 = vector.load %arg4[%c1, %c0_12, %c0_13] : memref<5x128x128xbf16, #tpu.memory_space<vmem>>, vector<1x128x128xbf16>
    %24 = vector.shape_cast %23 : vector<1x128x128xbf16> to vector<128x128xbf16>
    %cst_14 = arith.constant dense<0.000000e+00> : vector<8x128xf32>
    %25 = tpu.matmul %22, %24, %cst_14 {dimension_numbers = #tpu.dot_dimension_numbers<[1], [0], [0], [1], [0, 0, 1, 1], [], []>} : vector<8x128xbf16>, vector<128x128xbf16>, vector<8x128xf32> -> vector<8x128xf32>
    %26 = vector.extract_strided_slice %11 {offsets = [1, 0], sizes = [1, 128], strides = [1, 1]} : vector<5x128xf32> to vector<1x128xf32>
    %27 = vector.shape_cast %26 : vector<1x128xf32> to vector<128xf32>
    %28 = vector.shape_cast %27 : vector<128xf32> to vector<1x128xf32>
    %29 = vector.broadcast %28 : vector<1x128xf32> to vector<8x128xf32>
    %30 = arith.addf %25, %29 : vector<8x128xf32>
    %cst_15 = arith.constant 0.000000e+00 : f32
    %31 = vector.broadcast %cst_15 : f32 to vector<8x128xf32>
    %32 = arith.maximumf %30, %31 : vector<8x128xf32>
    %33 = arith.truncf %32 : vector<8x128xf32> to vector<8x128xbf16>
    %c2 = arith.constant 2 : index
    %c0_16 = arith.constant 0 : index
    %c0_17 = arith.constant 0 : index
    %34 = vector.load %arg4[%c2, %c0_16, %c0_17] : memref<5x128x128xbf16, #tpu.memory_space<vmem>>, vector<1x128x128xbf16>
    %35 = vector.shape_cast %34 : vector<1x128x128xbf16> to vector<128x128xbf16>
    %cst_18 = arith.constant dense<0.000000e+00> : vector<8x128xf32>
    %36 = tpu.matmul %33, %35, %cst_18 {dimension_numbers = #tpu.dot_dimension_numbers<[1], [0], [0], [1], [0, 0, 1, 1], [], []>} : vector<8x128xbf16>, vector<128x128xbf16>, vector<8x128xf32> -> vector<8x128xf32>
    %37 = vector.extract_strided_slice %11 {offsets = [2, 0], sizes = [1, 128], strides = [1, 1]} : vector<5x128xf32> to vector<1x128xf32>
    %38 = vector.shape_cast %37 : vector<1x128xf32> to vector<128xf32>
    %39 = vector.shape_cast %38 : vector<128xf32> to vector<1x128xf32>
    %40 = vector.broadcast %39 : vector<1x128xf32> to vector<8x128xf32>
    %41 = arith.addf %36, %40 : vector<8x128xf32>
    %cst_19 = arith.constant 0.000000e+00 : f32
    %42 = vector.broadcast %cst_19 : f32 to vector<8x128xf32>
    %43 = arith.maximumf %41, %42 : vector<8x128xf32>
    %44 = arith.truncf %43 : vector<8x128xf32> to vector<8x128xbf16>
    %c3 = arith.constant 3 : index
    %c0_20 = arith.constant 0 : index
    %c0_21 = arith.constant 0 : index
    %45 = vector.load %arg4[%c3, %c0_20, %c0_21] : memref<5x128x128xbf16, #tpu.memory_space<vmem>>, vector<1x128x128xbf16>
    %46 = vector.shape_cast %45 : vector<1x128x128xbf16> to vector<128x128xbf16>
    %cst_22 = arith.constant dense<0.000000e+00> : vector<8x128xf32>
    %47 = tpu.matmul %44, %46, %cst_22 {dimension_numbers = #tpu.dot_dimension_numbers<[1], [0], [0], [1], [0, 0, 1, 1], [], []>} : vector<8x128xbf16>, vector<128x128xbf16>, vector<8x128xf32> -> vector<8x128xf32>
    %48 = vector.extract_strided_slice %11 {offsets = [3, 0], sizes = [1, 128], strides = [1, 1]} : vector<5x128xf32> to vector<1x128xf32>
    %49 = vector.shape_cast %48 : vector<1x128xf32> to vector<128xf32>
    %50 = vector.shape_cast %49 : vector<128xf32> to vector<1x128xf32>
    %51 = vector.broadcast %50 : vector<1x128xf32> to vector<8x128xf32>
    %52 = arith.addf %47, %51 : vector<8x128xf32>
    %cst_23 = arith.constant 0.000000e+00 : f32
    %53 = vector.broadcast %cst_23 : f32 to vector<8x128xf32>
    %54 = arith.maximumf %52, %53 : vector<8x128xf32>
    %55 = arith.truncf %54 : vector<8x128xf32> to vector<8x128xbf16>
    %c4 = arith.constant 4 : index
    %c0_24 = arith.constant 0 : index
    %c0_25 = arith.constant 0 : index
    %56 = vector.load %arg4[%c4, %c0_24, %c0_25] : memref<5x128x128xbf16, #tpu.memory_space<vmem>>, vector<1x128x128xbf16>
    %57 = vector.shape_cast %56 : vector<1x128x128xbf16> to vector<128x128xbf16>
    %cst_26 = arith.constant dense<0.000000e+00> : vector<8x128xf32>
    %58 = tpu.matmul %55, %57, %cst_26 {dimension_numbers = #tpu.dot_dimension_numbers<[1], [0], [0], [1], [0, 0, 1, 1], [], []>} : vector<8x128xbf16>, vector<128x128xbf16>, vector<8x128xf32> -> vector<8x128xf32>
    %59 = vector.extract_strided_slice %11 {offsets = [4, 0], sizes = [1, 128], strides = [1, 1]} : vector<5x128xf32> to vector<1x128xf32>
    %60 = vector.shape_cast %59 : vector<1x128xf32> to vector<128xf32>
    %61 = vector.shape_cast %60 : vector<128xf32> to vector<1x128xf32>
    %62 = vector.broadcast %61 : vector<1x128xf32> to vector<8x128xf32>
    %63 = arith.addf %58, %62 : vector<8x128xf32>
    %cst_27 = arith.constant 0.000000e+00 : f32
    %64 = vector.broadcast %cst_27 : f32 to vector<8x128xf32>
    %65 = arith.maximumf %63, %64 : vector<8x128xf32>
    %66 = arith.truncf %65 : vector<8x128xf32> to vector<8x128xbf16>
    %c0_28 = arith.constant 0 : index
    %c0_29 = arith.constant 0 : index
    %67 = vector.load %arg6[%c0_28, %c0_29] : memref<128x20xbf16, #tpu.memory_space<vmem>>, vector<128x20xbf16>
    %cst_30 = arith.constant dense<0.000000e+00> : vector<8x20xf32>
    %68 = tpu.matmul %66, %67, %cst_30 {dimension_numbers = #tpu.dot_dimension_numbers<[1], [0], [0], [1], [0, 0, 1, 1], [], []>} : vector<8x128xbf16>, vector<128x20xbf16>, vector<8x20xf32> -> vector<8x20xf32>
    %c0_31 = arith.constant 0 : index
    %c0_32 = arith.constant 0 : index
    %69 = vector.load %arg7[%c0_31, %c0_32] : memref<8x20xf32, #tpu.memory_space<vmem>>, vector<8x20xf32>
    tpu.vector_store %arg7[%c0_31, %c0_32], %68 {strides = array<i32>} : memref<8x20xf32, #tpu.memory_space<vmem>>, vector<8x20xf32>,
    return
  }
  func.func @transform_0(%arg0: i32) -> (i32, i32) {
    %c0_i32 = arith.constant 0 : i32
    %c0_i32_0 = arith.constant 0 : i32
    return %arg0, %c0_i32 : i32, i32
  }
  func.func @transform_1(%arg0: i32) -> (i32, i32) {
    %c0_i32 = arith.constant 0 : i32
    %c0_i32_0 = arith.constant 0 : i32
    %c0_i32_1 = arith.constant 0 : i32
    return %c0_i32, %c0_i32_0 : i32, i32
  }
  func.func @transform_2(%arg0: i32) -> (i32, i32) {
    %c0_i32 = arith.constant 0 : i32
    %c0_i32_0 = arith.constant 0 : i32
    %c0_i32_1 = arith.constant 0 : i32
    return %c0_i32, %c0_i32_0 : i32, i32
  }
  func.func @transform_3(%arg0: i32) -> (i32, i32, i32) {
    %c0_i32 = arith.constant 0 : i32
    %c0_i32_0 = arith.constant 0 : i32
    %c0_i32_1 = arith.constant 0 : i32
    %c0_i32_2 = arith.constant 0 : i32
    return %c0_i32, %c0_i32_0, %c0_i32_1 : i32, i32, i32
  }
  func.func @transform_4(%arg0: i32) -> (i32, i32) {
    %c0_i32 = arith.constant 0 : i32
    %c0_i32_0 = arith.constant 0 : i32
    %c0_i32_1 = arith.constant 0 : i32
    return %c0_i32, %c0_i32_0 : i32, i32
  }
  func.func @transform_5(%arg0: i32) -> (i32, i32) {
    %c0_i32 = arith.constant 0 : i32
    %c0_i32_0 = arith.constant 0 : i32
    %c0_i32_1 = arith.constant 0 : i32
    return %c0_i32, %c0_i32_0 : i32, i32
  }
  func.func @transform_6(%arg0: i32) -> (i32, i32) {
    %c0_i32 = arith.constant 0 : i32
    %c0_i32_0 = arith.constant 0 : i32
    return %arg0, %c0_i32 : i32, i32
  }
}

</mosaic_0001>

<bundles_post_ra>
// kernel: complex_intercept_forward.1
= control target key start
LH: loop header
LB: loop body
LE: loop exit
PB: predicated region body
PF: predicated region fallthrough
CT: control target
= control target key end

     0   :  { %11 = vsyncpa [#allocation3], 0  ;;  %s1243_s0 = inlined_call_operand.vmem [shape: f32[8,1], index: 0, kind: input, shape index: {}]   ;;  %s1244_s1 = inlined_call_operand.vmem [shape: f32[1,128], index: 1, kind: input, shape index: {}]   ;;  %s1245_s2 = inlined_call_operand.vmem [shape: f32[1,128], index: 2, kind: input, shape index: {}]   ;;  %s1246_s3 = inlined_call_operand.hbm [shape: bf16[5,128,128], index: 3, kind: input, shape index: {}]   ;;  %s1247_s4 = inlined_call_operand.vmem [shape: f32[5,128], index: 4, kind: input, shape index: {}]   ;;  %s1248_s5 = inlined_call_operand.vmem [shape: bf16[128,20], index: 5, kind: input, shape index: {}]   ;;  %s1249_s6 = inlined_call_operand.hbm [shape: f32[8,20], index: 6, kind: output, shape index: {}]  }
   0x1   :  { %12 = vsyncpa [#allocation4], 0  ;;  %s1067_s21 = smov [#allocation2]   ;;  %s1019_s25 = scalar_lea.hbm %s1246_s3, 5120 }
   0x2   :  { %s24_s22 = sshll.u32 %s1067_s21, 4  ;;  %p1020_p0 = scmp.ne.s32.totalorder %s1246_s3, %s1019_s25  ;;  %s25_s22 = int_to_ptr.vmem [resolvable:$true] %s24_s22 }
   0x3   :  { %p1023_p1 = scmp.lt.u32.totalorder %s1019_s25, %s1246_s3 }
   0x5   :  { %p1025_p2 = pnand %p1023_p1, %p1020_p0 }
   0x7   :  { %1028 = shalt.err (!%p1025_p2)
}
   0x8   :  { %s1029_s30 = scalar_lea.vmem %s25_s22, 5120  ;;  %p1034_p4 = scmp.lt.s32.totalorder %s25_s22, %s25_s22 }
   0x9   :  { %p1030_p3 = scmp.ne.s32.totalorder %s25_s22, %s1029_s30  ;;  %p1035_p5 = scmp.lt.s32.totalorder %s1029_s30, %s1029_s30 }
   0xb   :  { %p1036_p6 = por %p1035_p5, %p1034_p4 }
   0xd   :  { %p1037_p7 = pnand %p1036_p6, %p1030_p3 }
   0xf   :  { %1040 = shalt.err (!%p1037_p7)
}
  0x10   :  { %s1068_s7 = smov 64   ;;  %s1069_s8 = smov 4  }
  0x11   :  { %30 = dma.hbm_to_vmem [thread:$0]  %s1246_s3, 5120, %s25_s22, [#allocation3], %s1068_s7, %s1068_s7, %s1069_s8  }
  0x12   :  { %1063 = dma.done.wait [#allocation3], 5120  }
  0x13   :  { %1064 = vsyncadd [#allocation3], 4294962176  ;;  %v1070_v0 = vmov 0   ;;  %v1071_v1 = vmov 0.0   ;;  %v39_v2 = vld [vmem:[%s1243_s0] sm:$0xff]  ;;  %v971_v3 = vld [vmem:[#allocation2] sm:$0xff]   ;;  %v80_v32 = vlaneseq }
  0x14   :  { %970 = vset.pattern.permute.xlu0 %v1070_v0  ;;  %843 = vmatprep.subr.bf16.mxu0 %v1071_v1  ;;  %v972_v4 = vld [vmem:[#allocation2 + $0x8] sm:$0xff]   ;;  %v973_v5 = vld [vmem:[#allocation2 + $0x10] sm:$0xff]   ;;  %vm1072_vm0 = vmmov 0   ;;  %v979_v6 = vld [vmem:[#allocation2 + $0x40] sm:$0xff]   ;;  %s1073_s30 = smov [#allocation5]   ;;  %vm722_vm1 = vcmask 162816  }
  0x15   :  { %863 = vmatprep.subr.bf16.mxu1 %v1071_v1  ;;  %43 = vperm.xlu0 %970, %v39_v2   ;;  %v974_v7 = vld [vmem:[#allocation2 + $0x18] sm:$0xff]   ;;  %v980_v8 = vld [vmem:[#allocation2 + $0x48] sm:$0xff]   ;;  %v975_v9 = vld [vmem:[#allocation2 + $0x20] sm:$0xff]   ;;  %v1160_v33 = vshrl.u32 %v80_v32, 7  ;;  %s730_s7 = sshll.u32 %s1073_s30, 4  ;;  %s731_s7 = int_to_ptr.vmem [resolvable:$true] %s730_s7 }
  0x16   :  { %844 = vmatpush3.bf16.msra.mxu0 %v971_v3  ;;  %859 = vmatprep.mubr.msk.bf16.mxu0 %vm1072_vm0, %v1071_v1  ;;  %v981_v10 = vld [vmem:[#allocation2 + $0x50] sm:$0xff]   ;;  %v976_v11 = vld [vmem:[#allocation2 + $0x28] sm:$0xff]   ;;  %v982_v12 = vld [vmem:[#allocation2 + $0x58] sm:$0xff]   ;;  %p1046_p9 = scmp.lt.s32.totalorder %s731_s7, %s731_s7 }
  0x17   :  { %845 = vmatprep.subr.bf16.mxu0 %v1071_v1  ;;  %879 = vmatprep.mubr.msk.bf16.mxu1 %vm1072_vm0, %v1071_v1  ;;  %v977_v13 = vld [vmem:[#allocation2 + $0x30] sm:$0xff]   ;;  %v983_v14 = vld [vmem:[#allocation2 + $0x60] sm:$0xff]   ;;  %v978_v15 = vld [vmem:[#allocation2 + $0x38] sm:$0xff]   ;;  %v82_v34 = vsub.s32 0, %v1160_v33  ;;  %v193_v52 = vsub.s32 1, %v1160_v33 }
  0x18   :  { %864 = vmatpush3.bf16.msra.mxu1 %v979_v6  ;;  %v984_v16 = vld [vmem:[#allocation2 + $0x68] sm:$0xff]   ;;  %v985_v24 = vld [vmem:[#allocation2 + $0x70] sm:$0xff]   ;;  %v986_v25 = vld [vmem:[#allocation2 + $0x78] sm:$0xff]   ;;  %v304_v6 = vsub.s32 2, %v1160_v33 }
  0x19   :  { %865 = vmatprep.subr.bf16.mxu1 %v1071_v1  ;;  %v739_v17 = vld [vmem:[%s1244_s1] ss:$0 sm:$0xff]  ;;  %v987_v26 = vld [vmem:[#allocation2 + $0x80] sm:$0xff]   ;;  %v989_v28 = vld [vmem:[#allocation2 + $0x90] sm:$0xff]  }
  0x1a   :  { %846 = vmatpush3.bf16.msra.mxu0 %v972_v4  ;;  %v740_v18 = vld [vmem:[%s1245_s2] ss:$0 sm:$0xff]  ;;  %v990_v29 = vld [vmem:[#allocation2 + $0x98] sm:$0xff]   ;;  %v991_v30 = vld [vmem:[#allocation2 + $0xa0] sm:$0xff]  }
  0x1b   :  { %847 = vmatprep.subr.bf16.mxu0 %v1071_v1  ;;  %v988_v27 = vld [vmem:[#allocation2 + $0x88] sm:$0xff]   ;;  %v993_v44 = vld [vmem:[#allocation2 + $0xb0] sm:$0xff]   ;;  %v994_v45 = vld [vmem:[#allocation2 + $0xb8] sm:$0xff]  }
  0x1c   :  { %866 = vmatpush3.bf16.msra.mxu1 %v980_v8  ;;  %v992_v31 = vld [vmem:[#allocation2 + $0xa8] sm:$0xff]   ;;  %v995_v46 = vld [vmem:[#allocation2 + $0xc0] sm:$0xff]   ;;  %v997_v48 = vld [vmem:[#allocation2 + $0xd0] sm:$0xff]  }
  0x1d   :  { %867 = vmatprep.subr.bf16.mxu1 %v1071_v1  ;;  %v1166_v35 = vld [vmem:[%s1247_s4] sm:$0x1f]  ;;  %v998_v49 = vld [vmem:[#allocation2 + $0xd8] sm:$0xff]   ;;  %v999_v50 = vld [vmem:[#allocation2 + $0xe0] sm:$0xff]  }
  0x1e   :  { %848 = vmatpush3.bf16.msra.mxu0 %v973_v5  ;;  %v83_v36 = vrot.slane %v1166_v35, %v82_v34  ;;  %v996_v47 = vld [vmem:[#allocation2 + $0xc8] sm:$0xff]   ;;  %v194_v53 = vrot.slane %v1166_v35, %v193_v52  ;;  %v1001_v61 = vld [vmem:[#allocation2 + $0xf0] sm:$0xff]   ;;  %v1002_v62 = vld [vmem:[#allocation2 + $0xf8] sm:$0xff]  }
  0x1f   :  { %849 = vmatprep.subr.bf16.mxu0 %v1071_v1  ;;  %v1000_v51 = vld [vmem:[#allocation2 + $0xe8] sm:$0xff]   ;;  %v1003_v63 = vld [vmem:[#allocation2 + $0x100] sm:$0xff]   ;;  %v1005_v2 = vld [vmem:[#allocation2 + $0x110] sm:$0xff]  }
  0x20   :  { %868 = vmatpush3.bf16.msra.mxu1 %v981_v10  ;;  %v1004_v0 = vld [vmem:[#allocation2 + $0x108] sm:$0xff]   ;;  %v1006_v3 = vld [vmem:[#allocation2 + $0x118] sm:$0xff]   ;;  %v1007_v4 = vld [vmem:[#allocation2 + $0x120] sm:$0xff]  }
  0x21   :  { %869 = vmatprep.subr.bf16.mxu1 %v1071_v1  ;;  %v1008_v5 = vld [vmem:[#allocation2 + $0x128] sm:$0xff]   ;;  %v1017_v32 = vld [vmem:[%s1248_s5 + $0x30] sm:$0xff]   ;;  %v1018_v34 = vld [vmem:[%s1248_s5 + $0x38] sm:$0xff]  }
  0x22   :  { %850 = vmatpush3.bf16.msra.mxu0 %v974_v7  ;;  %v305_v7 = vrot.slane %v1166_v35, %v304_v6 }
  0x23   :  { %851 = vmatprep.subr.bf16.mxu0 %v1071_v1 }
  0x24   :  { %870 = vmatpush3.bf16.msra.mxu1 %v982_v12 }
  0x25   :  { %871 = vmatprep.subr.bf16.mxu1 %v1071_v1 }
  0x26   :  { %852 = vmatpush3.bf16.msra.mxu0 %v975_v9 }
  0x27   :  { %853 = vmatprep.subr.bf16.mxu0 %v1071_v1 }
  0x28   :  { %872 = vmatpush3.bf16.msra.mxu1 %v983_v14 }
  0x29   :  { %873 = vmatprep.subr.bf16.mxu1 %v1071_v1 }
  0x2a   :  { %854 = vmatpush3.bf16.msra.mxu0 %v976_v11 }
  0x2b   :  { %855 = vmatprep.subr.bf16.mxu0 %v1071_v1 }
  0x2c   :  { %874 = vmatpush3.bf16.msra.mxu1 %v984_v16  ;;  %v1010_v16 = vld [vmem:[#allocation2 + $0x138] sm:$0xff]  }
  0x2d   :  { %875 = vmatprep.subr.bf16.mxu1 %v1071_v1 }
  0x2e   :  { %856 = vmatpush3.bf16.msra.mxu0 %v977_v13 }
  0x2f   :  { %857 = vmatprep.subr.bf16.mxu0 %v1071_v1 }
  0x30   :  { %876 = vmatpush3.bf16.msra.mxu1 %v985_v24 }
  0x31   :  { %877 = vmatprep.subr.bf16.mxu1 %v1071_v1 }
  0x32   :  { %858 = vmatpush3.bf16.msra.mxu0 %v978_v15  ;;  %v1009_v15 = vld [vmem:[#allocation2 + $0x130] sm:$0xff]  }
  0x33   :  { %883 = vmatprep.subr.bf16.mxu0 %v1071_v1 }
  0x34   :  { %878 = vmatpush3.bf16.msra.mxu1 %v986_v25 }
  0x35   :  { %903 = vmatprep.subr.bf16.mxu1 %v1071_v1 }
  0x94   :  { %v44_v19 = vpop.permute.xlu0 %43 }
  0x95   :  { %v52_v20 = vmul.f32 %v739_v17, %v44_v19  ;;  %v1011_v17 = vld [vmem:[%s1248_s5] sm:$0xff]   ;;  %v1013_v19 = vld [vmem:[%s1248_s5 + $0x10] sm:$0xff]  }
  0x97   :  { %v60_v21 = vadd.f32 %v740_v18, %v52_v20  ;;  %v1012_v18 = vld [vmem:[%s1248_s5 + $0x8] sm:$0xff]   ;;  %v1014_v20 = vld [vmem:[%s1248_s5 + $0x18] sm:$0xff]  }
  0x99   :  { %v61_v22 = vmax.f32 %v60_v21, 0.0  ;;  %v1015_v21 = vld [vmem:[%s1248_s5 + $0x20] sm:$0xff]  }
  0x9b   :  { %v62_v23 = vpack.c.bf16 %v61_v22, %v61_v22  ;;  %v1016_v22 = vld [vmem:[%s1248_s5 + $0x28] sm:$0xff]   ;;  %s1041_s5 = scalar_lea.vmem %s731_s7, 128 }
  0x9c   :  { %p1042_p8 = scmp.ne.s32.totalorder %s731_s7, %s1041_s5  ;;  %p1047_p10 = scmp.lt.s32.totalorder %s1041_s5, %s1041_s5 }
  0x9d   :  { %860 = vmatmul.mubr.bf16.vlgmr.msra.gmra.mrb[0].mxu0 %v62_v23  ;;  %v415_v23 = vsub.s32 3, %v1160_v33 }
  0x9e   :  { %899 = vmatprep.mubr.msk.bf16.mxu0 %vm1072_vm0, %v1071_v1  ;;  %884 = vmatpush3.bf16.msra.mxu0 %v987_v26  ;;  %p1048_p11 = por %p1047_p10, %p1046_p9 }
  0x9f   :  { %885 = vmatprep.subr.bf16.mxu0 %v1071_v1  ;;  %v416_v24 = vrot.slane %v1166_v35, %v415_v23 }
  0xa0   :  { %p1049_p12 = pnand %p1048_p11, %p1042_p8 }
  0xa2   :  { %886 = vmatpush3.bf16.msra.mxu0 %v988_v27 }
  0xa3   :  { %887 = vmatprep.subr.bf16.mxu0 %v1071_v1 }
  0xa6   :  { %888 = vmatpush3.bf16.msra.mxu0 %v989_v28 }
  0xa7   :  { %889 = vmatprep.subr.bf16.mxu0 %v1071_v1 }
  0xaa   :  { %890 = vmatpush3.bf16.msra.mxu0 %v990_v29 }
  0xab   :  { %891 = vmatprep.subr.bf16.mxu0 %v1071_v1 }
  0xae   :  { %892 = vmatpush3.bf16.msra.mxu0 %v991_v30 }
  0xaf   :  { %893 = vmatprep.subr.bf16.mxu0 %v1071_v1 }
  0xb2   :  { %894 = vmatpush3.bf16.msra.mxu0 %v992_v31 }
  0xb3   :  { %895 = vmatprep.subr.bf16.mxu0 %v1071_v1 }
  0xb6   :  { %896 = vmatpush3.bf16.msra.mxu0 %v993_v44 }
  0xb7   :  { %897 = vmatprep.subr.bf16.mxu0 %v1071_v1 }
  0xba   :  { %898 = vmatpush3.bf16.msra.mxu0 %v994_v45 }
  0xbb   :  { %923 = vmatprep.subr.bf16.mxu0 %v1071_v1 }
 0x170   :  { %v166_v37 = vpop.f32.mrb[0].mxu0 }
 0x171   :  { %v167_v38 = vadd.f32 %v166_v37, %v83_v36  ;;  %v861_v39 = vpop.f32.mrb[1].mxu0  ;;  %v526_v36 = vsub.s32 4, %v1160_v33 }
 0x172   :  { %v169_v40 = vpop.f32.mrb[2].mxu0 }
 0x173   :  { %v172_v41 = vmax.f32 %v167_v38, 0.0  ;;  %v862_v42 = vpop.f32.mrb[3].mxu0  ;;  %v527_v37 = vrot.slane %v1166_v35, %v526_v36 }
 0x175   :  { %v173_v43 = vpack.c.bf16 %v172_v41, %v172_v41 }
 0x177   :  { %880 = vmatmul.mubr.bf16.vlgmr.msra.gmra.mrb[0].mxu1 %v173_v43 }
 0x178   :  { %919 = vmatprep.mubr.msk.bf16.mxu1 %vm1072_vm0, %v1071_v1  ;;  %904 = vmatpush3.bf16.msra.mxu1 %v995_v46 }
 0x179   :  { %905 = vmatprep.subr.bf16.mxu1 %v1071_v1 }
 0x17c   :  { %906 = vmatpush3.bf16.msra.mxu1 %v996_v47 }
 0x17d   :  { %907 = vmatprep.subr.bf16.mxu1 %v1071_v1 }
 0x180   :  { %908 = vmatpush3.bf16.msra.mxu1 %v997_v48 }
 0x181   :  { %909 = vmatprep.subr.bf16.mxu1 %v1071_v1 }
 0x184   :  { %910 = vmatpush3.bf16.msra.mxu1 %v998_v49 }
 0x185   :  { %911 = vmatprep.subr.bf16.mxu1 %v1071_v1 }
 0x188   :  { %912 = vmatpush3.bf16.msra.mxu1 %v999_v50 }
 0x189   :  { %913 = vmatprep.subr.bf16.mxu1 %v1071_v1 }
 0x18c   :  { %914 = vmatpush3.bf16.msra.mxu1 %v1000_v51 }
 0x18d   :  { %915 = vmatprep.subr.bf16.mxu1 %v1071_v1 }
 0x190   :  { %916 = vmatpush3.bf16.msra.mxu1 %v1001_v61 }
 0x191   :  { %917 = vmatprep.subr.bf16.mxu1 %v1071_v1 }
 0x194   :  { %918 = vmatpush3.bf16.msra.mxu1 %v1002_v62 }
 0x195   :  { %943 = vmatprep.subr.bf16.mxu1 %v1071_v1 }
 0x24a   :  { %v277_v54 = vpop.f32.mrb[0].mxu1 }
 0x24b   :  { %v278_v55 = vadd.f32 %v277_v54, %v194_v53  ;;  %v881_v56 = vpop.f32.mrb[1].mxu1 }
 0x24c   :  { %v280_v57 = vpop.f32.mrb[2].mxu1 }
 0x24d   :  { %v283_v58 = vmax.f32 %v278_v55, 0.0  ;;  %v882_v59 = vpop.f32.mrb[3].mxu1 }
 0x24f   :  { %v284_v60 = vpack.c.bf16 %v283_v58, %v283_v58 }
 0x251   :  { %900 = vmatmul.mubr.bf16.vlgmr.msra.gmra.mrb[4].mxu0 %v284_v60 }
 0x252   :  { %939 = vmatprep.mubr.msk.bf16.mxu0 %vm1072_vm0, %v1071_v1  ;;  %924 = vmatpush3.bf16.msra.mxu0 %v1003_v63 }
 0x253   :  { %925 = vmatprep.subr.bf16.mxu0 %v1071_v1 }
 0x256   :  { %926 = vmatpush3.bf16.msra.mxu0 %v1004_v0 }
 0x257   :  { %927 = vmatprep.subr.bf16.mxu0 %v1071_v1 }
 0x25a   :  { %928 = vmatpush3.bf16.msra.mxu0 %v1005_v2 }
 0x25b   :  { %929 = vmatprep.subr.bf16.mxu0 %v1071_v1 }
 0x25e   :  { %930 = vmatpush3.bf16.msra.mxu0 %v1006_v3 }
 0x25f   :  { %931 = vmatprep.subr.bf16.mxu0 %v1071_v1 }
 0x262   :  { %932 = vmatpush3.bf16.msra.mxu0 %v1007_v4 }
 0x263   :  { %933 = vmatprep.subr.bf16.mxu0 %v1071_v1 }
 0x266   :  { %934 = vmatpush3.bf16.msra.mxu0 %v1008_v5 }
 0x267   :  { %935 = vmatprep.subr.bf16.mxu0 %v1071_v1 }
 0x26a   :  { %936 = vmatpush3.bf16.msra.mxu0 %v1009_v15 }
 0x26b   :  { %937 = vmatprep.subr.bf16.mxu0 %v1071_v1 }
 0x26e   :  { %938 = vmatpush3.bf16.msra.mxu0 %v1010_v16 }
 0x324   :  { %v388_v8 = vpop.f32.mrb[4].mxu0 }
 0x325   :  { %v389_v9 = vadd.f32 %v388_v8, %v305_v7  ;;  %v901_v10 = vpop.f32.mrb[5].mxu0 }
 0x326   :  { %v391_v11 = vpop.f32.mrb[6].mxu0 }
 0x327   :  { %v394_v12 = vmax.f32 %v389_v9, 0.0  ;;  %v902_v13 = vpop.f32.mrb[7].mxu0 }
 0x329   :  { %v395_v14 = vpack.c.bf16 %v394_v12, %v394_v12 }
 0x32b   :  { %920 = vmatmul.mubr.bf16.vlgmr.msra.gmra.mrb[4].mxu1 %v395_v14 }
 0x32c   :  { %959 = vmatprep.mubr.msk.bf16.mxu1 %vm1072_vm0, %v1071_v1  ;;  %944 = vmatpush3.bf16.msra.mxu1 %v1011_v17 }
 0x32d   :  { %945 = vmatprep.subr.bf16.mxu1 %v1071_v1 }
 0x330   :  { %946 = vmatpush3.bf16.msra.mxu1 %v1012_v18 }
 0x331   :  { %947 = vmatprep.subr.bf16.mxu1 %v1071_v1 }
 0x334   :  { %948 = vmatpush3.bf16.msra.mxu1 %v1013_v19 }
 0x335   :  { %949 = vmatprep.subr.bf16.mxu1 %v1071_v1 }
 0x338   :  { %950 = vmatpush3.bf16.msra.mxu1 %v1014_v20 }
 0x339   :  { %951 = vmatprep.subr.bf16.mxu1 %v1071_v1 }
 0x33c   :  { %952 = vmatpush3.bf16.msra.mxu1 %v1015_v21 }
 0x33d   :  { %953 = vmatprep.subr.bf16.mxu1 %v1071_v1 }
 0x340   :  { %954 = vmatpush3.bf16.msra.mxu1 %v1016_v22 }
 0x341   :  { %955 = vmatprep.subr.bf16.mxu1 %v1071_v1 }
 0x344   :  { %956 = vmatpush3.bf16.msra.mxu1 %v1017_v32 }
 0x345   :  { %957 = vmatprep.subr.bf16.mxu1 %v1071_v1 }
 0x348   :  { %958 = vmatpush3.bf16.msra.mxu1 %v1018_v34 }
 0x3fe   :  { %v499_v25 = vpop.f32.mrb[4].mxu1 }
 0x3ff   :  { %v500_v26 = vadd.f32 %v499_v25, %v416_v24  ;;  %v921_v27 = vpop.f32.mrb[5].mxu1 }
 0x400   :  { %v502_v28 = vpop.f32.mrb[6].mxu1 }
 0x401   :  { %v505_v29 = vmax.f32 %v500_v26, 0.0  ;;  %v922_v30 = vpop.f32.mrb[7].mxu1 }
 0x403   :  { %v506_v31 = vpack.c.bf16 %v505_v29, %v505_v29 }
 0x405   :  { %940 = vmatmul.mubr.bf16.vlgmr.msra.gmra.mrb[8].mxu0 %v506_v31 }
 0x4d8   :  { %v610_v38 = vpop.f32.mrb[8].mxu0 }
 0x4d9   :  { %v611_v39 = vadd.f32 %v610_v38, %v527_v37  ;;  %v941_v40 = vpop.f32.mrb[9].mxu0 }
 0x4da   :  { %v613_v41 = vpop.f32.mrb[10].mxu0 }
 0x4db   :  { %v616_v42 = vmax.f32 %v611_v39, 0.0  ;;  %v942_v43 = vpop.f32.mrb[11].mxu0 }
 0x4dd   :  { %v617_v44 = vpack.c.bf16 %v616_v42, %v616_v42 }
 0x4df   :  { %960 = vmatmul.mubr.bf16.vlgmr.msra.gmra.mrb[8].mxu1 %v617_v44 }
 0x5b2   :  { %v716_v1 = vpop.f32.mrb[8].mxu1 }
 0x5b3   :  { %v961_v45 = vpop.f32.mrb[9].mxu1  ;;  %723 = vst.msk [vmem:[#allocation5] sm:$0xff] %vm722_vm1, %v716_v1 }
 0x5b4   :  { %v719_v46 = vpop.f32.mrb[10].mxu1 }
 0x5b5   :  { %1052 = shalt.err (!%p1049_p12)
}
 0x5b6   :  { %s1053_s10 = scalar_lea.hbm %s1249_s6, 128 }
 0x5b7   :  { %p1054_p13 = scmp.ne.s32.totalorder %s1249_s6, %s1053_s10  ;;  %p1057_p0 = scmp.lt.u32.totalorder %s1053_s10, %s1249_s6 }
 0x5b9   :  { %p1059_p1 = pnand %p1057_p0, %p1054_p13 }
 0x5bb   :  { %1062 = shalt.err (!%p1059_p1)
}
 0x5bc   :  { %733 = dma.vmem_to_hbm [thread:$0]  %s731_s7, 128, %s1249_s6, [#allocation4]   ;;  %v962_v33 = vpop.f32.mrb[11].mxu1 }
 0x5bd   :  { %1065 = dma.done.wait [#allocation4], 128  }
 0x5be   :  { %1066 = vsyncadd [#allocation4], 4294967168 }
 0x5bf   :  { %737 = vsyncpa [#allocation3], 1 }
 0x5c0   :  { %738 = vsyncpa [#allocation4], 1 }

</bundles_post_ra>
